<compile_context>
chip_gen: v6e
topology: v6e:2x2x1
jax: 0.10.0
libtpu: 0.0.40
codegen_flags: <defaults>
</compile_context>

<pallas_src>
import jax
import jax.numpy as jnp
from jax.experimental import pallas as pl
from jax.experimental.pallas import tpu as pltpu


_VMEM_LIMIT = 32 * 1024 * 1024          # > v5e 16 MiB default scoped, safe on v7x (64 MiB phys)
_TARGET_BLOCK_BYTES = 2 * 1024 * 1024   # ~2 MiB f32 per block -> ~8 MiB live double-buffered in+out


def _round_up(n, m):
    return ((n + m - 1) // m) * m


def _pick_leading_block(n, bytes_per_row, *, align, target_bytes=_TARGET_BLOCK_BYTES):
    """Tile size along a leading axis: `align`-aligned, <= n, ~target_bytes,
    and (when possible) >= 2 grid steps so v7x can shard across both TCs."""
    if n <= align:
        return n
    blk = max(align, (target_bytes // max(1, bytes_per_row)) // align * align)
    blk = min(blk, (n // align) * align)
    if pl.cdiv(n, blk) < 2:
        half = _round_up(pl.cdiv(n, 2), align)
        blk = min(max(align, half), (n // align) * align)
    return blk


# ---------------------------------------------------------------------------
# Kernels
# ---------------------------------------------------------------------------
def _logprob_lane_kernel(x_ref, o_ref):
    """Per-row normalization; reduce along the last (lane) axis."""
    x = jnp.abs(x_ref[...].astype(jnp.float32))
    s = jnp.sum(x, axis=-1, keepdims=True)
    o_ref[...] = (jnp.log(x) - jnp.log(s)).astype(o_ref.dtype)


def _logprob_sublane_kernel(x_ref, o_ref):
    """Normalization along axis -2 of an (outer, R, inner) block (no HBM transpose)."""
    x = jnp.abs(x_ref[...].astype(jnp.float32))
    s = jnp.sum(x, axis=-2, keepdims=True)
    o_ref[...] = (jnp.log(x) - jnp.log(s)).astype(o_ref.dtype)


def _abs_sum_kernel(x_ref, s_ref):
    """dim=None pass 1: accumulate sum(|x|) into a grid-resident (1,1) output."""
    @pl.when(pl.program_id(0) == 0)
    def _():
        s_ref[...] = jnp.zeros_like(s_ref)
    s_ref[...] += jnp.sum(jnp.abs(x_ref[...].astype(jnp.float32)))


def _log_norm_kernel(s_ref, x_ref, o_ref):
    """dim=None pass 2: elementwise log(|x|) - log(s); s is an SMEM scalar."""
    x = jnp.abs(x_ref[...].astype(jnp.float32))
    o_ref[...] = (jnp.log(x) - jnp.log(s_ref[0, 0])).astype(o_ref.dtype)


# ---------------------------------------------------------------------------
# dim = None path (global normalization, two-pass, scales to any size)
# ---------------------------------------------------------------------------
def _logprob_global(x):
    orig_shape = x.shape
    n = x.size
    x_flat = x.reshape(-1)

    feat = 512 if n >= 8 * 512 else 128          # lane-dense output slab
    rows0 = pl.cdiv(n, feat)
    if rows0 <= 8:
        br = rows0
        rows = rows0
    else:
        br = _pick_leading_block(rows0, feat * 4, align=8)
        rows = _round_up(rows0, br)
    pad = rows * feat - n
    if pad:
        x_flat = jnp.pad(x_flat, (0, pad))       # zeros do not change sum(|x|)
    x2 = x_flat.reshape(rows, feat)
    grid = (rows // br,)

    # Pass 1: global sum(|x|) via a resident accumulator output.
    s = pl.pallas_call(
        _abs_sum_kernel,
        out_shape=jax.ShapeDtypeStruct((1, 1), jnp.float32),
        grid_spec=pltpu.PrefetchScalarGridSpec(
            num_scalar_prefetch=0,
            grid=grid,
            in_specs=[pl.BlockSpec((br, feat), lambda i: (i, 0))],
            out_specs=pl.BlockSpec((1, 1), lambda i: (0, 0)),
        ),
        compiler_params=pltpu.CompilerParams(
            dimension_semantics=("arbitrary",),
            vmem_limit_bytes=_VMEM_LIMIT),
    )(x2)

    # Pass 2: tiled elementwise log(|x|) - log(s), s as SMEM scalar.
    out2 = pl.pallas_call(
        _log_norm_kernel,
        out_shape=jax.ShapeDtypeStruct((rows, feat), x.dtype),
        grid_spec=pltpu.PrefetchScalarGridSpec(
            num_scalar_prefetch=0,
            grid=grid,
            in_specs=[pl.BlockSpec(memory_space=pltpu.MemorySpace.SMEM),
                      pl.BlockSpec((br, feat), lambda i: (i, 0))],
            out_specs=pl.BlockSpec((br, feat), lambda i: (i, 0)),
        ),
        compiler_params=pltpu.CompilerParams(
            dimension_semantics=("parallel",),
            vmem_limit_bytes=_VMEM_LIMIT),
    )(s, x2)

    out_flat = out2.reshape(-1)
    if pad:
        out_flat = out_flat[:n]
    return out_flat.reshape(orig_shape)


# ---------------------------------------------------------------------------
# Wrapper (JAX/Pallas equivalent of LogProbabilityDistribution(dim).forward)
# ---------------------------------------------------------------------------
def log_probability_distribution(x, dim=None):
    if dim is None:
        return _logprob_global(x)

    dim = dim % x.ndim

    if dim == x.ndim - 1:
        # Reduce along the innermost (lane) axis: flatten to (rows, feat), no transpose.
        feat = x.shape[-1]
        rows = 1
        for d in x.shape[:-1]:
            rows *= d
        x2 = x.reshape(rows, feat)
        # TODO(synk): for vocab-sized feat (>>128K) the lane axis should also be
        # blocked with a two-pass sum; not needed at these sizes.
        br = _pick_leading_block(rows, feat * 4, align=8)
        out2 = pl.pallas_call(
            _logprob_lane_kernel,
            out_shape=jax.ShapeDtypeStruct((rows, feat), x.dtype),
            grid_spec=pltpu.PrefetchScalarGridSpec(
                num_scalar_prefetch=0,
                grid=(pl.cdiv(rows, br),),     # ragged last block: rows independent, OOB rows discarded
                in_specs=[pl.BlockSpec((br, feat), lambda i: (i, 0))],
                out_specs=pl.BlockSpec((br, feat), lambda i: (i, 0)),
            ),
            compiler_params=pltpu.CompilerParams(
                dimension_semantics=("parallel",),
                vmem_limit_bytes=_VMEM_LIMIT),
        )(x2)
        return out2.reshape(x.shape)

    # dim is not the last axis: keep the ORIGINAL memory layout (no HBM transpose),
    # view as (outer, R, inner) and reduce along the middle axis in-kernel.
    outer = 1
    for d in x.shape[:dim]:
        outer *= d
    R = x.shape[dim]
    inner = 1
    for d in x.shape[dim + 1:]:
        inner *= d
    x3 = x.reshape(outer, R, inner)
    # TODO(synk): if R * inner alone exceeds the VMEM budget, switch to a
    # two-pass (sum kernel + elementwise) scheme; not needed at these sizes.
    ot = _pick_leading_block(outer, R * inner * 4, align=1)
    out3 = pl.pallas_call(
        _logprob_sublane_kernel,
        out_shape=jax.ShapeDtypeStruct((outer, R, inner), x.dtype),
        grid_spec=pltpu.PrefetchScalarGridSpec(
            num_scalar_prefetch=0,
            grid=(pl.cdiv(outer, ot),),
            in_specs=[pl.BlockSpec((ot, R, inner), lambda i: (i, 0, 0))],
            out_specs=pl.BlockSpec((ot, R, inner), lambda i: (i, 0, 0)),
        ),
        compiler_params=pltpu.CompilerParams(
            dimension_semantics=("parallel",),
            vmem_limit_bytes=_VMEM_LIMIT),
    )(x3)
    return out3.reshape(x.shape)


# ---------------------------------------------------------------------------
# Reference (pure JAX, mirrors the PyTorch forward exactly)
# ---------------------------------------------------------------------------
def _reference(x, dim=None):
    a = jnp.abs(x)
    if dim is None:
        s = jnp.sum(a).reshape((1,) * x.ndim)
    else:
        s = jnp.sum(a, axis=dim, keepdims=True)
    return jnp.log(a / s)


# ---------------------------------------------------------------------------
# Demo / self-test
# ---------------------------------------------------------------------------
if __name__ == "__main__":
    key = jax.random.PRNGKey(0)
    k1, k2, k3 = jax.random.split(key, 3)

    # Case 1: dim = -1 (per-row distribution), shape (batch, seq, hidden)
    x1 = jax.random.normal(k1, (2, 8, 32), dtype=jnp.float32)
    out1 = jax.block_until_ready(log_probability_distribution(x1, dim=-1))
    ref1 = _reference(x1, dim=-1)
    assert jnp.allclose(out1, ref1, atol=1e-4, rtol=1e-5), "dim=-1 mismatch"

    # Case 2: dim = None (global normalization), NCHW-like tensor
    x2 = jax.random.normal(k2, (2, 4, 16, 16), dtype=jnp.float32)
    out2 = jax.block_until_ready(log_probability_distribution(x2, dim=None))
    ref2 = _reference(x2, dim=None)
    assert jnp.allclose(out2, ref2, atol=1e-4, rtol=1e-5), "dim=None mismatch"

    # Case 3: dim = 1 (channel distribution, non-last axis -> no HBM transpose)
    x3 = jax.random.normal(k3, (2, 4, 16, 16), dtype=jnp.float32)
    out3 = jax.block_until_ready(log_probability_distribution(x3, dim=1))
    ref3 = _reference(x3, dim=1)
    assert jnp.allclose(out3, ref3, atol=1e-4, rtol=1e-5), "dim=1 mismatch"

    print("KERNEL_OK")
</pallas_src>

<mosaic_0001>
module attributes {stable_mosaic.version = 11 : i64} {
  func.func @_logprob_lane_kernel(%arg0: i32, %arg1: memref<8x32xf32, #tpu.memory_space<vmem>>, %arg2: memref<8x32xf32, #tpu.memory_space<vmem>>) attributes {dimension_semantics = [#tpu.dimension_semantics<parallel>], iteration_bounds = array<i64: 2>, scalar_prefetch = 0 : i64, scratch_operands = 0 : i64, tpu.core_type = #tpu.core_type<tc>, window_params = [{transform_indices = @transform_0, window_bounds = array<i64: 8, 32>}, {transform_indices = @transform_1, window_bounds = array<i64: 8, 32>}]} {
    %c0 = arith.constant 0 : index
    %c0_0 = arith.constant 0 : index
    %0 = vector.load %arg1[%c0, %c0_0] : memref<8x32xf32, #tpu.memory_space<vmem>>, vector<8x32xf32>
    %1 = math.absf %0 : vector<8x32xf32>
    %cst = arith.constant dense<0.000000e+00> : vector<8xf32>
    %2 = vector.multi_reduction <add>, %1, %cst [1] : vector<8x32xf32> to vector<8xf32>
    %3 = vector.shape_cast %2 : vector<8xf32> to vector<8x1xf32>
    %4 = math.log %1 : vector<8x32xf32>
    %5 = math.log %3 : vector<8x1xf32>
    %6 = vector.broadcast %5 : vector<8x1xf32> to vector<8x32xf32>
    %7 = arith.subf %4, %6 : vector<8x32xf32>
    %c0_1 = arith.constant 0 : index
    %c0_2 = arith.constant 0 : index
    %8 = vector.load %arg2[%c0_1, %c0_2] : memref<8x32xf32, #tpu.memory_space<vmem>>, vector<8x32xf32>
    tpu.vector_store %arg2[%c0_1, %c0_2], %7 {strides = array<i32>} : memref<8x32xf32, #tpu.memory_space<vmem>>, vector<8x32xf32>,
    return
  }
  func.func @transform_0(%arg0: i32) -> (i32, i32) {
    %c0_i32 = arith.constant 0 : i32
    %c0_i32_0 = arith.constant 0 : i32
    return %arg0, %c0_i32 : i32, i32
  }
  func.func @transform_1(%arg0: i32) -> (i32, i32) {
    %c0_i32 = arith.constant 0 : i32
    %c0_i32_0 = arith.constant 0 : i32
    return %arg0, %c0_i32 : i32, i32
  }
}

</mosaic_0001>

<bundles_post_ra>
// kernel: tpu_custom_call.1
= control target key start
LH: loop header
LB: loop body
LE: loop exit
PB: predicated region body
PF: predicated region fallthrough
CT: control target
= control target key end

     0   :  { %6 = vsyncpa [#allocation3], 0  ;;  %s539_s0 = inlined_call_operand.hbm [shape: f32[16,32], index: 0, kind: input, shape index: {}]   ;;  %s540_s1 = inlined_call_operand.hbm [shape: f32[16,32], index: 1, kind: output, shape index: {}]  }
   0x1   :  { %8 = vsyncpa [#allocation3 + $0x1], 0 }
   0x2   :  { %9 = vsyncpa [#allocation4], 0 }
   0x3   :  { %11 = vsyncpa [#allocation4 + $0x1], 0  ;;  %s396_s6 = smov 0   ;;  %s398_s7 = smov 0  }
   0x4   :  { %s400_s8 = smov 0   ;;  %s402_s9 = smov 0  }
   0x5 LB: > { %s417_s10 = sadd.s32 4294967295, %s382_s9   ;;  %s228_s11 = sadd.s32 4294967294, %s382_s9   ;;  %s382_s9 = sphi %s402_s9, %s557_s9   ;;  %s378_s8 = sphi %s400_s8, %s556_s8   ;;  %s374_s7 = sphi %s398_s7, %s555_s7   ;;  %s370_s6 = sphi %s396_s6, %s554_s6  }
   0x6   : > { %s421_s12 = sadd.s32 1, %s382_s9   ;;  %s24_s13 = sadd.s32 1, %s378_s8 }
   0x7   : > { %s21_s14 = ssub.s32 %s382_s9, %s421_s12  ;;  %p31_p0 = scmp.ne.s32.totalorder %s378_s8, %s374_s7 }
   0x8   : > { %p22_p1 = scmp.eq.s32.totalorder %s21_s14, 0  ;;  %p32_p2 = scmp.eq.s32.totalorder %s382_s9, 0 }
   0x9   : > { %p37_p3 = scmp.ne.s32.totalorder %s374_s7, %s370_s6  ;;  %p38_p4 = scmp.eq.s32.totalorder %s417_s10, 0 }
   0xa   : > { %s433_s15 = scalar_select %p22_p1, %s378_s8, %s24_s13  }
   0xb   : > { %p435_p5 = por %p32_p2, %p31_p0  ;;  %p439_p6 = por %p38_p4, %p37_p3 }
   0xc   : > { %p61_p7 = scmp.eq.s32.totalorder %s417_s10, 1  ;;  %p67_p8 = scmp.eq.s32.totalorder %s228_s11, 1 }
   0xd   : > { %s544_s17 = scalar_select %p439_p6, 1, 0 }
   0xe   : > { %p252_p10 = scmp.lt.s32.totalorder %s382_s9, 2  ;;  %p446_p11 = por %p61_p7, %p31_p0 }
   0xf   : > { %p450_p12 = por %p67_p8, %p37_p3  ;;  %s87_s20 = sand.u32 1, %s378_s8  }
  0x10   : > { %s545_s18 = scalar_select %p446_p11, 1, 0 }
  0x11   : > { %s546_s19 = scalar_select %p450_p12, 1, 0 }
  0x12   : > { %s232_s21 = sshll.u32 %s382_s9, 7  ;;  %s231_s22 = sshll.u32 %s87_s20, 3 }
  0x13   : > { %s459_s25 = scalar_lea.hbm %s539_s0, %s232_s21  ;;  %s91_s26 = scalar_lea.vmem [#allocation2], %s231_s22 }
  0x14   : > { %s98_s27 = sshll.u32 %s91_s26, 4  ;;  %p463_p13 = pnand %p252_p10, %p435_p5  ;;  %s467_s27 = int_to_ptr.vmem [resolvable:$true] %s98_s27 }
  0x15   : > { %s88_s29 = scalar_lea.sflag [#allocation3], %s87_s20  ;;  %s290_s30 = scalar_lea.hbm %s459_s25, 128 }
  0x16   : > { %p291_p2 = scmp.ne.s32.totalorder %s459_s25, %s290_s30  ;;  %p292_p3 = pneg %p463_p13 }
  0x17   : > { %s295_s4 = scalar_lea.hbm %s539_s0, 256  ;;  %p296_p5 = scmp.lt.s32.totalorder %s459_s25, %s539_s0 }
  0x18   : > { %p293_p4 = pnand %p292_p3, %p291_p2  ;;  %p297_p8 = scmp.lt.s32.totalorder %s295_s4, %s290_s30 }
  0x1a   : > { %p294_p7 = pneg %p293_p4  ;;  %p298_p10 = por %p297_p8, %p296_p5 }
  0x1c   : > { %p299_p9 = pnand %p298_p10, %p294_p7 }
  0x1e   : > { %302 = shalt.err (!%p299_p9)
}
  0x1f   : > { %s303_s13 = scalar_lea.vmem %s467_s27, 128  ;;  %s384_s14 = smov [#allocation2]  }
  0x20   : > { %p304_p0 = scmp.ne.s32.totalorder %s467_s27, %s303_s13  ;;  %s308_s16 = sshll.u32 %s384_s14, 4  ;;  %s309_s16 = int_to_ptr.vmem [resolvable:$false] %s308_s16 }
  0x21   : > { %s310_s20 = scalar_lea.vmem %s309_s16, 256  ;;  %p311_p4 = scmp.lt.s32.totalorder %s467_s27, %s309_s16 }
  0x22   : > { %p306_p1 = pnand %p304_p0, %p292_p3  ;;  %p312_p12 = scmp.lt.s32.totalorder %s310_s20, %s303_s13 }
  0x24   : > { %p307_p2 = pneg %p306_p1  ;;  %p313_p11 = por %p312_p12, %p311_p4 }
  0x26   : > { %p314_p6 = pnand %p313_p11, %p307_p2 }
  0x28   : > { %317 = shalt.err (!%p314_p6)
}
  0x29   : > { %247 = dma.hbm_to_vmem [thread:$0]  (!%p463_p13), %s459_s25, 128, %s467_s27, %s88_s29  }
  0x2a   : > { %p548_p9 = scmp.lt.s32.totalorder %s382_s9, 3  ;;  %p549_p7 = scmp.ge.s32.totalorder %s382_s9, 1 }
  0x2c   : > { %p104_p0 = pnand %p549_p7, %p548_p9 }
  0x2d   : > { %s494_s21 = sand.u32 (!%p104_p0), 1, %s374_s7   ;;  %p550_p6 = scmp.ne.s32.totalorder (!%p104_p0), %s544_s17, 0 }
  0x2e   : > { %107 = sbr.rel (%p104_p0) target bundleno = 225 (0xe1), region = 24  ;;  %s234_s22 = sshll.u32 (!%p104_p0), %s494_s21, 3 }
  0x2f   : > { %s110_s23 = scalar_lea.sflag (!%p104_p0), [#allocation3], %s494_s21  ;;  %s113_s24 = scalar_lea.vmem (!%p104_p0), [#allocation2], %s234_s22 }
  0x33   : > { %361 = dma.done.wait (%p550_p6), %s110_s23, 128  }
  0x34   : > { %363 = vsyncadd (%p550_p6), %s110_s23, 4294967168  ;;  %v132_v0 = vld [vmem:[%s113_s24] sm:$0xff]  ;;  %vm134_vm0 = vcmask 261120   ;;  %s237_s25 = sshll.u32 %s417_s10, 7  ;;  %s131_s26 = scalar_lea.vmem [#allocation5], %s234_s22 }
  0x35   : > { %v133_v1 = vand.u32 2147483647, %v132_v0  ;;  %s158_s27 = sshll.u32 %s131_s26, 4  ;;  %s156_s29 = scalar_lea.hbm %s540_s1, %s237_s25  ;;  %s159_s27 = int_to_ptr.vmem [resolvable:$true] %s158_s27 }
  0x36   : > { %s145_s30 = scalar_lea.sflag [#allocation4], %s494_s21  ;;  %s318_s2 = scalar_lea.vmem %s159_s27, 128 }
  0x37   : > { %v135_v2 = vsel %vm134_vm0, %v133_v1, 0.0  ;;  %286 = vlog2.f32 %v133_v1  ;;  %p319_p11 = scmp.ne.s32.totalorder %s159_s27, %s318_s2  ;;  %p551_p12 = scmp.ne.s32.totalorder %s545_s18, 0 }
  0x38   : > { %136 = vadd.xlane.f32.xlu0 %v135_v2  ;;  %s385_s3 = smov [#allocation5]  }
  0x39   : > { %p320_p13 = pnand %p319_p11, %p551_p12  ;;  %s322_s4 = sshll.u32 %s385_s3, 4  ;;  %s323_s4 = int_to_ptr.vmem [resolvable:$false] %s322_s4 }
  0x3a   : > { %s324_s10 = scalar_lea.vmem %s323_s4, 256  ;;  %p325_p3 = scmp.lt.s32.totalorder %s159_s27, %s323_s4 }
  0x3b   : > { %p321_p1 = pneg %p320_p13  ;;  %p326_p5 = scmp.lt.s32.totalorder %s324_s10, %s318_s2 }
  0x3d   : > { %p327_p8 = por %p326_p5, %p325_p3 }
  0x3f   : > { %p328_p10 = pnand %p327_p8, %p321_p1 }
  0x44   : > { %v287_v4 = vpop.eup %286 }
  0x45   : > { %v139_v5 = vmul.f32 0.6931472, %v287_v4 }
  0xc1   : > { %v137_v3 = vpop.xlane.xlu0 %136 }
  0xc2   : > { %288 = vlog2.f32 %v137_v3 }
  0xcf   : > { %v289_v6 = vpop.eup %288 }
  0xd0   : > { %v141_v7 = vmul.f32 0.6931472, %v289_v6 }
  0xd2   : > { %v142_v8 = vsub.f32 %v139_v5, %v141_v7 }
  0xd4   : > { %143 = vst.msk [vmem:[%s131_s26] sm:$0xff] %vm134_vm0, %v142_v8 }
  0xd5   : > { %331 = shalt.err (!%p328_p10)
}
  0xd6   : > { %s332_s5 = scalar_lea.hbm %s156_s29, 128  ;;  %s336_s14 = scalar_lea.hbm %s540_s1, 256 }
  0xd7   : > { %p333_p2 = scmp.ne.s32.totalorder %s156_s29, %s332_s5  ;;  %p337_p7 = scmp.lt.s32.totalorder %s156_s29, %s540_s1 }
  0xd8   : > { %p338_p0 = scmp.lt.s32.totalorder %s336_s14, %s332_s5 }
  0xd9   : > { %p334_p4 = pnand %p333_p2, %p551_p12 }
  0xda   : > { %p339_p6 = por %p338_p0, %p337_p7 }
  0xdb   : > { %p335_p9 = pneg %p334_p4 }
  0xdd   : > { %p340_p11 = pnand %p339_p6, %p335_p9 }
  0xdf   : > { %343 = shalt.err (!%p340_p11)
}
  0xe0   : > { %242 = dma.vmem_to_hbm [thread:$0]  (%p551_p12), %s159_s27, 128, %s156_s29, %s145_s30  }
  0xe1 PF: > { %s170_s21 = sand.u32 1, %s370_s6   ;;  %p552_p13 = scmp.ne.s32.totalorder %s546_s19, 0 }
  0xe2   : > { %p553_p1 = scmp.ge.s32.totalorder %s382_s9, 2  ;;  %s171_s22 = scalar_lea.sflag [#allocation4], %s170_s21 }
  0xe4   : > { %p249_p3 = pnand %p553_p1, %p552_p13 }
  0xe6   : > { %p250_p5 = pneg %p249_p3 }
  0xe8   : > { %365 = dma.done.wait (%p250_p5), %s171_s22, 128  }
  0xe9   : > { %367 = vsyncadd (%p250_p5), %s171_s22, 4294967168  ;;  %p14_p8 = scmp.ge.s32.totalorder %s421_s12, 4   ;;  %s554_s6 = smov %s374_s7 }
  0xea   : > { %s555_s7 = smov %s378_s8  ;;  %s556_s8 = smov %s433_s15 }
  0xeb   : > { %s557_s9 = smov %s421_s12  ;;  %16 = sbr.rel (!%p14_p8) target bundleno = 5 (0x5), region = 69 }
  0xf0   :  { %176 = vsyncpa [#allocation3], 1 }
  0xf1   :  { %178 = vsyncpa [#allocation3 + $0x1], 1 }
  0xf2   :  { %179 = vsyncpa [#allocation4], 1 }
  0xf3   :  { %181 = vsyncpa [#allocation4 + $0x1], 1 }

</bundles_post_ra>
